<compile_context>
chip_gen: v7x
topology: tpu7x:2x2x1
jax: 0.10.0
libtpu: 0.0.40
codegen_flags: <defaults>
</compile_context>

<pallas_src>
import functools

import jax
import jax.numpy as jnp
from jax.experimental import pallas as pl
from jax.experimental.pallas import tpu as pltpu


def _round_up(x: int, m: int) -> int:
    return (x + m - 1) // m * m


def _readout_if_kernel(x_ref, w_ref, b_ref, mem0_ref,   # inputs
                       seq_ref,                          # output (mem at every step)
                       acc_ref):                         # VMEM scratch (running mem)
    tb = pl.program_id(1)                                # time-block index (innermost)

    # First time block of this output tile: load the initial membrane state.
    @pl.when(tb == 0)
    def _init():
        acc_ref[...] = mem0_ref[...]

    tt, bp, din = x_ref.shape
    tn = w_ref.shape[1]

    # One well-shaped GEMM for the whole time block:
    #   [(tile_t*B_p), Din_p] @ [Din_p, tile_n]  (bf16 in, f32 accumulate).
    # B_p % 8 == 0 and Din_p % 128 == 0, so the merge-reshape is tile-aligned (free).
    x2d = x_ref[...].reshape(tt * bp, din)
    d = jnp.dot(x2d, w_ref[...], preferred_element_type=jnp.float32)
    d = d.reshape(tt, bp, tn) + b_ref[...]               # bias folded in, one vector add

    # Purely-additive IF recurrence -> short prefix sum over the time block.
    # tt is a small static int; this unrolls into tt VPU adds + lane-dense stores.
    mem = acc_ref[...]
    for i in range(tt):
        mem = mem + d[i]
        seq_ref[i] = mem.astype(seq_ref.dtype)
    acc_ref[...] = mem                                    # carry state to next block


@functools.partial(jax.jit, static_argnames=("tile_n", "tile_t", "use_bf16"))
def readout_integrator_if_forward(input_spikes, weight, bias, mem0, *,
                                  tile_n=None, tile_t=None, use_bf16=True):
    """Run T fused readout_integrator_if steps.

    input_spikes: [T, B, Din]   spike train (any float/bool)
    weight      : [Dout, Din]   PyTorch nn.Linear weight layout
    bias        : [Dout] or None
    mem0        : [B, Dout]     initial membrane state (set_neuron_state -> zeros)
    Returns (mem_seq [T, B, Dout], mem_final [B, Dout]).
    """
    T, B, Din = input_spikes.shape
    Dout = weight.shape[0]

    # Lane/sublane-dense padding: batch -> multiple of 8, feature dims -> 128.
    B_p = _round_up(B, 8)
    Din_p = _round_up(Din, 128)
    Dout_p = _round_up(Dout, 128)

    # Output-tile width: prefer >= 2 tiles (so the "parallel" axis feeds both v7x
    # TensorCores) once Dout_p >= 256; cap at 512 for VMEM headroom on v5e/v7x.
    if tile_n is None:
        if Dout_p <= 128:
            tile_n = Dout_p
        else:
            tile_n = 128
            for cand in (512, 384, 256, 128):
                if Dout_p % cand == 0 and Dout_p // cand >= 2:
                    tile_n = cand
                    break
    assert Dout_p % tile_n == 0 and tile_n % 128 == 0
    n_tiles = Dout_p // tile_n

    # Time-block size: aim for ~256 GEMM rows (tile_t * B_p) to fill the MXU and
    # amortize per-grid-step overhead.  T is padded (zero spikes) to a multiple.
    if tile_t is None:
        tile_t = max(1, min(T, 256 // B_p))
    T_p = _round_up(T, tile_t)
    n_tblocks = T_p // tile_t

    cdtype = jnp.bfloat16 if use_bf16 else jnp.float32
    itemsize = 2 if use_bf16 else 4
    f32 = jnp.float32

    # --- pad + cast (single jnp.pad per array; skipped when already aligned) ---
    x = input_spikes.astype(f32)
    if (T_p, B_p, Din_p) != (T, B, Din):
        x = jnp.pad(x, ((0, T_p - T), (0, B_p - B), (0, Din_p - Din)))
    x = x.astype(cdtype)                                   # spikes are 0/1 -> exact

    w_t = weight.astype(f32).T                             # store transposed: x @ W
    if (Din_p, Dout_p) != (Din, Dout):
        w_t = jnp.pad(w_t, ((0, Din_p - Din), (0, Dout_p - Dout)))
    w_t = w_t.astype(cdtype)

    if bias is None:
        b_p = jnp.zeros((1, Dout_p), f32)
    else:
        b_p = bias.astype(f32).reshape(1, Dout)
        if Dout_p != Dout:
            b_p = jnp.pad(b_p, ((0, 0), (0, Dout_p - Dout)))

    m_p = mem0.astype(f32)
    if (B_p, Dout_p) != (B, Dout):
        m_p = jnp.pad(m_p, ((0, B_p - B), (0, Dout_p - Dout)))

    # --- VMEM budget estimate (double-buffered pipeline) + cost hint ---
    vmem_est = (2 * tile_t * B_p * Din_p * itemsize        # x blocks (streamed)
                + 2 * Din_p * tile_n * itemsize            # weight tile (t-invariant)
                + 2 * tile_t * B_p * tile_n * 4            # seq out blocks (f32)
                + 2 * (tile_n * 4 + B_p * tile_n * 4)      # bias + mem0 tiles
                + B_p * tile_n * 4)                        # acc scratch
    vmem_limit = min(max(vmem_est + (4 << 20), 16 << 20), 48 << 20)

    cost = pl.CostEstimate(
        flops=2 * T_p * B_p * Din_p * Dout_p,
        transcendentals=0,
        bytes_accessed=(n_tiles * T_p * B_p * Din_p * itemsize   # x streamed per n tile
                        + Din_p * Dout_p * itemsize              # weights
                        + (1 + B_p) * Dout_p * 4                 # bias + mem0
                        + T_p * B_p * Dout_p * 4))               # mem sequence out

    grid_spec = pltpu.PrefetchScalarGridSpec(
        num_scalar_prefetch=0,
        grid=(n_tiles, n_tblocks),                               # time blocks innermost
        in_specs=[
            # spike block: tile_t timesteps streamed per grid step
            pl.BlockSpec((tile_t, B_p, Din_p), lambda n, t: (t, 0, 0)),
            # weight / bias / mem0 tiles: constant in t -> VMEM-resident over the loop
            pl.BlockSpec((Din_p, tile_n), lambda n, t: (0, n)),
            pl.BlockSpec((1, tile_n), lambda n, t: (0, n)),
            pl.BlockSpec((B_p, tile_n), lambda n, t: (0, n)),
        ],
        out_specs=pl.BlockSpec((tile_t, B_p, tile_n), lambda n, t: (t, 0, n)),
        scratch_shapes=[pltpu.VMEM((B_p, tile_n), jnp.float32)],
    )

    mem_seq_p = pl.pallas_call(
        _readout_if_kernel,
        out_shape=jax.ShapeDtypeStruct((T_p, B_p, Dout_p), f32),
        grid_spec=grid_spec,
        compiler_params=pltpu.CompilerParams(
            dimension_semantics=("parallel", "arbitrary"),
            vmem_limit_bytes=int(vmem_limit)),
        cost_estimate=cost,
    )(x, w_t, b_p, m_p)

    mem_seq = mem_seq_p[:T, :B, :Dout]
    mem_final = mem_seq_p[T - 1, :B, :Dout]                # final state == last step's mem
    return mem_seq, mem_final


if __name__ == "__main__":
    # Small shapes consistent with the module: T=8 steps, batch=2, Din=32, Dout=16.
    T, B, Din, Dout = 8, 2, 32, 16
    key = jax.random.PRNGKey(0)
    k_x, k_w, k_b, k_m = jax.random.split(key, 4)

    # nn.Linear-style init.
    bound = 1.0 / (Din ** 0.5)
    weight = jax.random.uniform(k_w, (Dout, Din), jnp.float32, -bound, bound)
    bias = jax.random.uniform(k_b, (Dout,), jnp.float32, -bound, bound)

    # 0/1 spike train; nonzero initial mem to exercise the state-carry path
    # (set_neuron_state would give zeros).
    spikes = (jax.random.uniform(k_x, (T, B, Din)) > 0.7).astype(jnp.float32)
    mem0 = 0.1 * jax.random.normal(k_m, (B, Dout), jnp.float32)

    mem_seq, mem_final = readout_integrator_if_forward(spikes, weight, bias, mem0)
    mem_seq, mem_final = jax.block_until_ready((mem_seq, mem_final))

    # Pure-JAX reference: T sequential module-forward calls.  The kernel feeds the
    # MXU bf16 operands with f32 accumulation, so the reference uses the same
    # bf16-rounded weight (spikes are 0/1 -> exact in bf16) in full f32 math.
    w_q = weight.astype(jnp.bfloat16).astype(jnp.float32)
    mem = mem0
    ref_steps = []
    for t in range(T):
        d_input = jnp.dot(spikes[t], w_q.T,
                          precision=jax.lax.Precision.HIGHEST) + bias
        mem = mem + d_input                              # 'if' readout update
        ref_steps.append(mem)
    ref_seq = jnp.stack(ref_steps)

    assert mem_seq.shape == (T, B, Dout)
    assert mem_final.shape == (B, Dout)
    assert jnp.allclose(mem_seq, ref_seq, atol=1e-4, rtol=1e-4), "seq mismatch"
    assert jnp.allclose(mem_final, ref_seq[-1], atol=1e-4, rtol=1e-4), "final mismatch"

    print("KERNEL_OK")
</pallas_src>

<mosaic_0001>
module attributes {stable_mosaic.version = 11 : i64} {
  func.func @_readout_if_kernel(%arg0: i32, %arg1: i32, %arg2: memref<8x8x128xbf16, #tpu.memory_space<vmem>>, %arg3: memref<128x128xbf16, #tpu.memory_space<vmem>>, %arg4: memref<1x128xf32, #tpu.memory_space<vmem>>, %arg5: memref<8x128xf32, #tpu.memory_space<vmem>>, %arg6: memref<8x8x128xf32, #tpu.memory_space<vmem>>, %arg7: memref<8x128xf32, #tpu.memory_space<vmem>>) attributes {dimension_semantics = [#tpu.dimension_semantics<parallel>, #tpu.dimension_semantics<arbitrary>], iteration_bounds = array<i64: 1, 1>, scalar_prefetch = 0 : i64, scratch_operands = 1 : i64, tpu.core_type = #tpu.core_type<tc>, window_params = [{transform_indices = @transform_0, window_bounds = array<i64: 8, 8, 128>}, {transform_indices = @transform_1, window_bounds = array<i64: 128, 128>}, {transform_indices = @transform_2, window_bounds = array<i64: 1, 128>}, {transform_indices = @transform_3, window_bounds = array<i64: 8, 128>}, {transform_indices = @transform_4, window_bounds = array<i64: 8, 8, 128>}]} {
    %c0_i32 = arith.constant 0 : i32
    %0 = arith.cmpi eq, %arg1, %c0_i32 : i32
    %1 = arith.extui %0 : i1 to i32
    %c0_i32_0 = arith.constant 0 : i32
    %2 = arith.cmpi ne, %1, %c0_i32_0 : i32
    scf.if %2 {
      %c0_28 = arith.constant 0 : index
      %c0_29 = arith.constant 0 : index
      %62 = vector.load %arg5[%c0_28, %c0_29] : memref<8x128xf32, #tpu.memory_space<vmem>>, vector<8x128xf32>
      %c0_30 = arith.constant 0 : index
      %c0_31 = arith.constant 0 : index
      %63 = vector.load %arg7[%c0_30, %c0_31] : memref<8x128xf32, #tpu.memory_space<vmem>>, vector<8x128xf32>
      tpu.vector_store %arg7[%c0_30, %c0_31], %62 {strides = array<i32>} : memref<8x128xf32, #tpu.memory_space<vmem>>, vector<8x128xf32>,
    } else {
    }
    %c0 = arith.constant 0 : index
    %c0_1 = arith.constant 0 : index
    %c0_2 = arith.constant 0 : index
    %3 = vector.load %arg2[%c0, %c0_1, %c0_2] : memref<8x8x128xbf16, #tpu.memory_space<vmem>>, vector<8x8x128xbf16>
    %4 = vector.shape_cast %3 : vector<8x8x128xbf16> to vector<64x128xbf16>
    %c0_3 = arith.constant 0 : index
    %c0_4 = arith.constant 0 : index
    %5 = vector.load %arg3[%c0_3, %c0_4] : memref<128x128xbf16, #tpu.memory_space<vmem>>, vector<128x128xbf16>
    %cst = arith.constant dense<0.000000e+00> : vector<64x128xf32>
    %6 = tpu.matmul %4, %5, %cst {dimension_numbers = #tpu.dot_dimension_numbers<[1], [0], [0], [1], [0, 0, 1, 1], [], []>} : vector<64x128xbf16>, vector<128x128xbf16>, vector<64x128xf32> -> vector<64x128xf32>
    %7 = vector.shape_cast %6 : vector<64x128xf32> to vector<8x8x128xf32>
    %c0_5 = arith.constant 0 : index
    %c0_6 = arith.constant 0 : index
    %8 = vector.load %arg4[%c0_5, %c0_6] : memref<1x128xf32, #tpu.memory_space<vmem>>, vector<1x128xf32>
    %9 = vector.shape_cast %8 : vector<1x128xf32> to vector<1x1x128xf32>
    %10 = vector.broadcast %9 : vector<1x1x128xf32> to vector<8x8x128xf32>
    %11 = arith.addf %7, %10 : vector<8x8x128xf32>
    %c0_7 = arith.constant 0 : index
    %c0_8 = arith.constant 0 : index
    %12 = vector.load %arg7[%c0_7, %c0_8] : memref<8x128xf32, #tpu.memory_space<vmem>>, vector<8x128xf32>
    %13 = vector.extract_strided_slice %11 {offsets = [0, 0, 0], sizes = [1, 8, 128], strides = [1, 1, 1]} : vector<8x8x128xf32> to vector<1x8x128xf32>
    %14 = vector.shape_cast %13 : vector<1x8x128xf32> to vector<8x128xf32>
    %15 = arith.addf %12, %14 : vector<8x128xf32>
    %c0_9 = arith.constant 0 : index
    %c0_10 = arith.constant 0 : index
    %c0_11 = arith.constant 0 : index
    %16 = vector.load %arg6[%c0_9, %c0_10, %c0_11] : memref<8x8x128xf32, #tpu.memory_space<vmem>>, vector<1x8x128xf32>
    %17 = vector.shape_cast %16 : vector<1x8x128xf32> to vector<8x128xf32>
    %18 = vector.shape_cast %15 : vector<8x128xf32> to vector<1x8x128xf32>
    tpu.vector_store %arg6[%c0_9, %c0_10, %c0_11], %18 {strides = array<i32>} : memref<8x8x128xf32, #tpu.memory_space<vmem>>, vector<1x8x128xf32>,
    %19 = vector.extract_strided_slice %11 {offsets = [1, 0, 0], sizes = [1, 8, 128], strides = [1, 1, 1]} : vector<8x8x128xf32> to vector<1x8x128xf32>
    %20 = vector.shape_cast %19 : vector<1x8x128xf32> to vector<8x128xf32>
    %21 = arith.addf %15, %20 : vector<8x128xf32>
    %c1 = arith.constant 1 : index
    %c0_12 = arith.constant 0 : index
    %c0_13 = arith.constant 0 : index
    %22 = vector.load %arg6[%c1, %c0_12, %c0_13] : memref<8x8x128xf32, #tpu.memory_space<vmem>>, vector<1x8x128xf32>
    %23 = vector.shape_cast %22 : vector<1x8x128xf32> to vector<8x128xf32>
    %24 = vector.shape_cast %21 : vector<8x128xf32> to vector<1x8x128xf32>
    tpu.vector_store %arg6[%c1, %c0_12, %c0_13], %24 {strides = array<i32>} : memref<8x8x128xf32, #tpu.memory_space<vmem>>, vector<1x8x128xf32>,
    %25 = vector.extract_strided_slice %11 {offsets = [2, 0, 0], sizes = [1, 8, 128], strides = [1, 1, 1]} : vector<8x8x128xf32> to vector<1x8x128xf32>
    %26 = vector.shape_cast %25 : vector<1x8x128xf32> to vector<8x128xf32>
    %27 = arith.addf %21, %26 : vector<8x128xf32>
    %c2 = arith.constant 2 : index
    %c0_14 = arith.constant 0 : index
    %c0_15 = arith.constant 0 : index
    %28 = vector.load %arg6[%c2, %c0_14, %c0_15] : memref<8x8x128xf32, #tpu.memory_space<vmem>>, vector<1x8x128xf32>
    %29 = vector.shape_cast %28 : vector<1x8x128xf32> to vector<8x128xf32>
    %30 = vector.shape_cast %27 : vector<8x128xf32> to vector<1x8x128xf32>
    tpu.vector_store %arg6[%c2, %c0_14, %c0_15], %30 {strides = array<i32>} : memref<8x8x128xf32, #tpu.memory_space<vmem>>, vector<1x8x128xf32>,
    %31 = vector.extract_strided_slice %11 {offsets = [3, 0, 0], sizes = [1, 8, 128], strides = [1, 1, 1]} : vector<8x8x128xf32> to vector<1x8x128xf32>
    %32 = vector.shape_cast %31 : vector<1x8x128xf32> to vector<8x128xf32>
    %33 = arith.addf %27, %32 : vector<8x128xf32>
    %c3 = arith.constant 3 : index
    %c0_16 = arith.constant 0 : index
    %c0_17 = arith.constant 0 : index
    %34 = vector.load %arg6[%c3, %c0_16, %c0_17] : memref<8x8x128xf32, #tpu.memory_space<vmem>>, vector<1x8x128xf32>
    %35 = vector.shape_cast %34 : vector<1x8x128xf32> to vector<8x128xf32>
    %36 = vector.shape_cast %33 : vector<8x128xf32> to vector<1x8x128xf32>
    tpu.vector_store %arg6[%c3, %c0_16, %c0_17], %36 {strides = array<i32>} : memref<8x8x128xf32, #tpu.memory_space<vmem>>, vector<1x8x128xf32>,
    %37 = vector.extract_strided_slice %11 {offsets = [4, 0, 0], sizes = [1, 8, 128], strides = [1, 1, 1]} : vector<8x8x128xf32> to vector<1x8x128xf32>
    %38 = vector.shape_cast %37 : vector<1x8x128xf32> to vector<8x128xf32>
    %39 = arith.addf %33, %38 : vector<8x128xf32>
    %c4 = arith.constant 4 : index
    %c0_18 = arith.constant 0 : index
    %c0_19 = arith.constant 0 : index
    %40 = vector.load %arg6[%c4, %c0_18, %c0_19] : memref<8x8x128xf32, #tpu.memory_space<vmem>>, vector<1x8x128xf32>
    %41 = vector.shape_cast %40 : vector<1x8x128xf32> to vector<8x128xf32>
    %42 = vector.shape_cast %39 : vector<8x128xf32> to vector<1x8x128xf32>
    tpu.vector_store %arg6[%c4, %c0_18, %c0_19], %42 {strides = array<i32>} : memref<8x8x128xf32, #tpu.memory_space<vmem>>, vector<1x8x128xf32>,
    %43 = vector.extract_strided_slice %11 {offsets = [5, 0, 0], sizes = [1, 8, 128], strides = [1, 1, 1]} : vector<8x8x128xf32> to vector<1x8x128xf32>
    %44 = vector.shape_cast %43 : vector<1x8x128xf32> to vector<8x128xf32>
    %45 = arith.addf %39, %44 : vector<8x128xf32>
    %c5 = arith.constant 5 : index
    %c0_20 = arith.constant 0 : index
    %c0_21 = arith.constant 0 : index
    %46 = vector.load %arg6[%c5, %c0_20, %c0_21] : memref<8x8x128xf32, #tpu.memory_space<vmem>>, vector<1x8x128xf32>
    %47 = vector.shape_cast %46 : vector<1x8x128xf32> to vector<8x128xf32>
    %48 = vector.shape_cast %45 : vector<8x128xf32> to vector<1x8x128xf32>
    tpu.vector_store %arg6[%c5, %c0_20, %c0_21], %48 {strides = array<i32>} : memref<8x8x128xf32, #tpu.memory_space<vmem>>, vector<1x8x128xf32>,
    %49 = vector.extract_strided_slice %11 {offsets = [6, 0, 0], sizes = [1, 8, 128], strides = [1, 1, 1]} : vector<8x8x128xf32> to vector<1x8x128xf32>
    %50 = vector.shape_cast %49 : vector<1x8x128xf32> to vector<8x128xf32>
    %51 = arith.addf %45, %50 : vector<8x128xf32>
    %c6 = arith.constant 6 : index
    %c0_22 = arith.constant 0 : index
    %c0_23 = arith.constant 0 : index
    %52 = vector.load %arg6[%c6, %c0_22, %c0_23] : memref<8x8x128xf32, #tpu.memory_space<vmem>>, vector<1x8x128xf32>
    %53 = vector.shape_cast %52 : vector<1x8x128xf32> to vector<8x128xf32>
    %54 = vector.shape_cast %51 : vector<8x128xf32> to vector<1x8x128xf32>
    tpu.vector_store %arg6[%c6, %c0_22, %c0_23], %54 {strides = array<i32>} : memref<8x8x128xf32, #tpu.memory_space<vmem>>, vector<1x8x128xf32>,
    %55 = vector.extract_strided_slice %11 {offsets = [7, 0, 0], sizes = [1, 8, 128], strides = [1, 1, 1]} : vector<8x8x128xf32> to vector<1x8x128xf32>
    %56 = vector.shape_cast %55 : vector<1x8x128xf32> to vector<8x128xf32>
    %57 = arith.addf %51, %56 : vector<8x128xf32>
    %c7 = arith.constant 7 : index
    %c0_24 = arith.constant 0 : index
    %c0_25 = arith.constant 0 : index
    %58 = vector.load %arg6[%c7, %c0_24, %c0_25] : memref<8x8x128xf32, #tpu.memory_space<vmem>>, vector<1x8x128xf32>
    %59 = vector.shape_cast %58 : vector<1x8x128xf32> to vector<8x128xf32>
    %60 = vector.shape_cast %57 : vector<8x128xf32> to vector<1x8x128xf32>
    tpu.vector_store %arg6[%c7, %c0_24, %c0_25], %60 {strides = array<i32>} : memref<8x8x128xf32, #tpu.memory_space<vmem>>, vector<1x8x128xf32>,
    %c0_26 = arith.constant 0 : index
    %c0_27 = arith.constant 0 : index
    %61 = vector.load %arg7[%c0_26, %c0_27] : memref<8x128xf32, #tpu.memory_space<vmem>>, vector<8x128xf32>
    tpu.vector_store %arg7[%c0_26, %c0_27], %57 {strides = array<i32>} : memref<8x128xf32, #tpu.memory_space<vmem>>, vector<8x128xf32>,
    return
  }
  func.func @transform_0(%arg0: i32, %arg1: i32) -> (i32, i32, i32) {
    %c0_i32 = arith.constant 0 : i32
    %c0_i32_0 = arith.constant 0 : i32
    %c0_i32_1 = arith.constant 0 : i32
    return %arg1, %c0_i32, %c0_i32_0 : i32, i32, i32
  }
  func.func @transform_1(%arg0: i32, %arg1: i32) -> (i32, i32) {
    %c0_i32 = arith.constant 0 : i32
    %c0_i32_0 = arith.constant 0 : i32
    return %c0_i32, %arg0 : i32, i32
  }
  func.func @transform_2(%arg0: i32, %arg1: i32) -> (i32, i32) {
    %c0_i32 = arith.constant 0 : i32
    %c0_i32_0 = arith.constant 0 : i32
    return %c0_i32, %arg0 : i32, i32
  }
  func.func @transform_3(%arg0: i32, %arg1: i32) -> (i32, i32) {
    %c0_i32 = arith.constant 0 : i32
    %c0_i32_0 = arith.constant 0 : i32
    return %c0_i32, %arg0 : i32, i32
  }
  func.func @transform_4(%arg0: i32, %arg1: i32) -> (i32, i32, i32) {
    %c0_i32 = arith.constant 0 : i32
    %c0_i32_0 = arith.constant 0 : i32
    return %arg1, %c0_i32, %arg0 : i32, i32, i32
  }
}

</mosaic_0001>

<bundles_post_ra>
// kernel: readout_integrator_if_forward.1
= control target key start
LH: loop header
LB: loop body
LE: loop exit
PB: predicated region body
PF: predicated region fallthrough
CT: control target
= control target key end

     0   :  { %s404_s1 = inlined_call_operand.vmem [shape: bf16[128,128], index: 1, kind: input, shape index: {}]   ;;  %s405_s0 = inlined_call_operand.vmem [shape: bf16[8,8,128], index: 0, kind: input, shape index: {}]   ;;  %s406_s2 = inlined_call_operand.vmem [shape: f32[1,128], index: 2, kind: input, shape index: {}]   ;;  %s407_s3 = inlined_call_operand.vmem [shape: f32[8,128], index: 3, kind: input, shape index: {}]   ;;  %s408_s4 = inlined_call_operand.vmem [shape: f32[8,8,128], index: 4, kind: output, shape index: {}]  }
   0x1   :  { %v301_v0 = vld [vmem:[%s404_s1] sm:$0xff]   ;;  %v302_v1 = vld [vmem:[%s404_s1 + $0x8] sm:$0xff]   ;;  %v303_v2 = vld [vmem:[%s404_s1 + $0x10] sm:$0xff]  }
   0x2   :  { %261 = vmatprep.subr.bf16.mxu0 %v301_v0  ;;  %285 = vmatprep.subr.bf16.mxu1 %v301_v0  ;;  %v304_v3 = vld [vmem:[%s404_s1 + $0x18] sm:$0xff]   ;;  %v309_v4 = vld [vmem:[%s405_s0] sm:$0xff]   ;;  %v311_v5 = vld [vmem:[%s405_s0 + $0x10] sm:$0xff]  }
   0x3   :  { %262 = vmatpush3.bf16.msra.mxu0 %v301_v0  ;;  %293 = vmatpush3.bf16.msra.mxu1 %v301_v0  ;;  %v305_v6 = vld [vmem:[%s404_s1 + $0x20] sm:$0xff]   ;;  %v306_v7 = vld [vmem:[%s404_s1 + $0x28] sm:$0xff]   ;;  %v307_v8 = vld [vmem:[%s404_s1 + $0x30] sm:$0xff]  }
   0x4   :  { %263 = vmatprep.subr.bf16.mxu0 %v302_v1  ;;  %286 = vmatprep.subr.bf16.mxu1 %v302_v1  ;;  %v308_v9 = vld [vmem:[%s404_s1 + $0x38] sm:$0xff]   ;;  %v310_v10 = vld [vmem:[%s405_s0 + $0x8] sm:$0xff]   ;;  %v241_v12 = vld [vmem:[%s406_s2] ss:$0 sm:$0xff] }
   0x5   :  { %277 = vmatprep.mubr.bf16.mxu0 %v309_v4  ;;  %281 = vmatprep.mubr.bf16.mxu1 %v311_v5  ;;  %v312_v11 = vld [vmem:[%s405_s0 + $0x18] sm:$0xff]   ;;  %v22_v15 = vld [vmem:[%s407_s3] sm:$0xff] }
   0x7   :  { %264 = vmatpush3.bf16.msra.mxu0 %v302_v1  ;;  %294 = vmatpush3.bf16.msra.mxu1 %v302_v1 }
   0x8   :  { %265 = vmatprep.subr.bf16.mxu0 %v303_v2  ;;  %287 = vmatprep.subr.bf16.mxu1 %v303_v2 }
   0xb   :  { %266 = vmatpush3.bf16.msra.mxu0 %v303_v2  ;;  %295 = vmatpush3.bf16.msra.mxu1 %v303_v2 }
   0xc   :  { %267 = vmatprep.subr.bf16.mxu0 %v304_v3  ;;  %288 = vmatprep.subr.bf16.mxu1 %v304_v3 }
   0xf   :  { %268 = vmatpush3.bf16.msra.mxu0 %v304_v3  ;;  %296 = vmatpush3.bf16.msra.mxu1 %v304_v3 }
  0x10   :  { %269 = vmatprep.subr.bf16.mxu0 %v305_v6  ;;  %289 = vmatprep.subr.bf16.mxu1 %v305_v6 }
  0x13   :  { %270 = vmatpush3.bf16.msra.mxu0 %v305_v6  ;;  %297 = vmatpush3.bf16.msra.mxu1 %v305_v6 }
  0x14   :  { %271 = vmatprep.subr.bf16.mxu0 %v306_v7  ;;  %290 = vmatprep.subr.bf16.mxu1 %v306_v7 }
  0x17   :  { %272 = vmatpush3.bf16.msra.mxu0 %v306_v7  ;;  %298 = vmatpush3.bf16.msra.mxu1 %v306_v7 }
  0x18   :  { %273 = vmatprep.subr.bf16.mxu0 %v307_v8  ;;  %291 = vmatprep.subr.bf16.mxu1 %v307_v8 }
  0x1b   :  { %274 = vmatpush3.bf16.msra.mxu0 %v307_v8  ;;  %299 = vmatpush3.bf16.msra.mxu1 %v307_v8 }
  0x1c   :  { %275 = vmatprep.subr.bf16.mxu0 %v308_v9  ;;  %292 = vmatprep.subr.bf16.mxu1 %v308_v9 }
  0x1f   :  { %276 = vmatpush3.bf16.msra.mxu0 %v308_v9  ;;  %300 = vmatpush3.bf16.msra.mxu1 %v308_v9 }
  0x22   :  { %278 = vmatmul.mubr.bf16.vlgmr.msra.gmra.mrb[0].mxu0 %v310_v10  ;;  %282 = vmatmul.mubr.bf16.vlgmr.msra.gmra.mrb[0].mxu1 %v312_v11 }
  0xf5   :  { %v279_v13 = vpop.f32.mrb[0].mxu0  ;;  %v283_v14 = vpop.f32.mrb[0].mxu1 }
  0xf6   :  { %v154_v16 = vpop.f32.mrb[1].mxu0  ;;  %v170_v17 = vpop.f32.mrb[1].mxu1  ;;  %v194_v25 = vadd.f32 %v279_v13, %v241_v12  ;;  %v198_v33 = vadd.f32 %v283_v14, %v241_v12 }
  0xf7   :  { %v192_v18 = vadd.f32 %v241_v12, %v154_v16  ;;  %v280_v19 = vpop.f32.mrb[2].mxu0  ;;  %v284_v20 = vpop.f32.mrb[2].mxu1  ;;  %v196_v29 = vadd.f32 %v241_v12, %v170_v17 }
  0xf8   :  { %v157_v21 = vpop.f32.mrb[3].mxu0  ;;  %v173_v22 = vpop.f32.mrb[3].mxu1  ;;  %v195_v27 = vadd.f32 %v280_v19, %v241_v12  ;;  %v199_v35 = vadd.f32 %v284_v20, %v241_v12 }
  0xf9   :  { %v201_v23 = vadd.f32 %v192_v18, %v22_v15  ;;  %v193_v24 = vadd.f32 %v241_v12, %v157_v21  ;;  %v197_v32 = vadd.f32 %v241_v12, %v173_v22 }
  0xfb   :  { %202 = vst [vmem:[%s408_s4] sm:$0xff] %v201_v23  ;;  %v203_v26 = vadd.f32 %v201_v23, %v193_v24 }
  0xfd   :  { %242 = vst [vmem:[%s408_s4 + $0x8] sm:$0xff] %v203_v26  ;;  %v206_v28 = vadd.f32 %v203_v26, %v194_v25 }
  0xff   :  { %243 = vst [vmem:[%s408_s4 + $0x10] sm:$0xff] %v206_v28  ;;  %v209_v30 = vadd.f32 %v206_v28, %v195_v27 }
 0x101   :  { %244 = vst [vmem:[%s408_s4 + $0x18] sm:$0xff] %v209_v30  ;;  %v212_v31 = vadd.f32 %v209_v30, %v196_v29 }
 0x103   :  { %245 = vst [vmem:[%s408_s4 + $0x20] sm:$0xff] %v212_v31  ;;  %v215_v34 = vadd.f32 %v212_v31, %v197_v32 }
 0x105   :  { %246 = vst [vmem:[%s408_s4 + $0x28] sm:$0xff] %v215_v34  ;;  %v218_v36 = vadd.f32 %v215_v34, %v198_v33 }
 0x107   :  { %247 = vst [vmem:[%s408_s4 + $0x30] sm:$0xff] %v218_v36  ;;  %v221_v37 = vadd.f32 %v218_v36, %v199_v35 }
 0x109   :  { %248 = vst [vmem:[%s408_s4 + $0x38] sm:$0xff] %v221_v37 }

</bundles_post_ra>
